<compile_context>
chip_gen: v7x
topology: tpu7x:2x2x1
jax: 0.10.0
libtpu: 0.0.40
codegen_flags: <defaults>
</compile_context>

<pallas_src>
import functools

import jax
import jax.numpy as jnp
from jax.experimental import pallas as pl
from jax.experimental.pallas import tpu as pltpu

# ---------------- model config (small, synthetic) ----------------
N_EMBD = 32
N_HEAD = 4
HEAD_DIM = N_EMBD // N_HEAD
BATCH = 2
SEQ = 8
LN_EPS = 1e-5
NEG_INF = -1e30

# ------- packed-parameter slab layout: one (TOTAL_ROWS, 128) f32 buffer -----
PACK_COLS = 128
ROW_LN1W, ROW_LN1B = 0, 1
ROW_BQKV = 2                       # cols 0:96  (q-part pre-scaled)
ROW_BO = 3
ROW_LN2W, ROW_LN2B = 4, 5
ROW_BFC = 6                        # cols 0:128
ROW_BPR = 7
ROW_WQKV = 8                       # 32 rows, cols 0:96 (q-part pre-scaled)
ROW_WO = ROW_WQKV + N_EMBD         # 40, 32 rows, cols 0:32
ROW_WFC = ROW_WO + N_EMBD          # 72, 32 rows, cols 0:128
ROW_WPR = ROW_WFC + N_EMBD         # 104, 128 rows, cols 0:32
TOTAL_ROWS = ROW_WPR + 4 * N_EMBD  # 232 (multiple of 8)


def _layernorm(h, w, b):
    mu = jnp.mean(h, axis=-1, keepdims=True)
    var = jnp.mean((h - mu) ** 2, axis=-1, keepdims=True)
    return (h - mu) * jax.lax.rsqrt(var + LN_EPS) * w + b


def _gelu_exact(h):
    # PyTorch nn.GELU() default = exact erf formulation.
    return 0.5 * h * (1.0 + jax.lax.erf(h * (1.0 / jnp.sqrt(2.0))))


def block_kernel(x_ref, pk_ref, out_ref, *, seq_len):
    f32 = jnp.float32
    C, H, HD = N_EMBD, N_HEAD, HEAD_DIM

    x = x_ref[...].astype(f32)                        # (BT, C) — all batches at once
    bt = x.shape[0]
    n_batch = bt // seq_len                           # static

    # ---- static slices of the packed parameter slab (views; free) ----
    ln1w = pk_ref[ROW_LN1W:ROW_LN1W + 1, 0:C]
    ln1b = pk_ref[ROW_LN1B:ROW_LN1B + 1, 0:C]
    bqkv = pk_ref[ROW_BQKV:ROW_BQKV + 1, 0:3 * C]
    bo = pk_ref[ROW_BO:ROW_BO + 1, 0:C]
    ln2w = pk_ref[ROW_LN2W:ROW_LN2W + 1, 0:C]
    ln2b = pk_ref[ROW_LN2B:ROW_LN2B + 1, 0:C]
    bfc = pk_ref[ROW_BFC:ROW_BFC + 1, 0:4 * C]
    bpr = pk_ref[ROW_BPR:ROW_BPR + 1, 0:C]
    wqkv = pk_ref[ROW_WQKV:ROW_WQKV + C, 0:3 * C]     # (32, 96)
    wo = pk_ref[ROW_WO:ROW_WO + C, 0:C]               # (32, 32)
    wfc = pk_ref[ROW_WFC:ROW_WFC + C, 0:4 * C]        # (32, 128)
    wpr = pk_ref[ROW_WPR:ROW_WPR + 4 * C, 0:C]        # (128, 32)

    # ---------------- attention branch ----------------
    h = _layernorm(x, ln1w, ln1b)                     # (BT, C)

    # fused QKV projection: one matmul (1/sqrt(head_dim) folded into q cols)
    qkv = jnp.dot(h, wqkv, preferred_element_type=f32) + bqkv     # (BT, 3C)

    # split heads once: lane slices + stack -> (H, BT, HD)
    def heads(base):
        return jnp.stack(
            [qkv[:, base + hh * HD:base + (hh + 1) * HD] for hh in range(H)],
            axis=0)

    q = heads(0)
    k = heads(C)
    v = heads(2 * C)

    # scores + block-diagonal causal mask (built in-kernel; no DMA, no int div)
    s = jnp.einsum('htd,hsd->hts', q, k, preferred_element_type=f32)  # (H,BT,BT)
    row = jax.lax.broadcasted_iota(jnp.int32, (bt, bt), 0)
    col = jax.lax.broadcasted_iota(jnp.int32, (bt, bt), 1)
    same = None
    for b in range(n_batch):                           # trace-time loop (tiny, static)
        lo, hi = b * seq_len, (b + 1) * seq_len
        blk = (row >= lo) & (row < hi) & (col >= lo) & (col < hi)
        same = blk if same is None else (same | blk)
    ok = (row >= col) & same
    s = jnp.where(ok[None, :, :], s, NEG_INF)

    s = s - jnp.max(s, axis=-1, keepdims=True)
    ex = jnp.exp(s)
    # EUP approx reciprocal (otherwise-idle slot); exact fallback: ex / sum
    p = ex * pl.reciprocal(jnp.sum(ex, axis=-1, keepdims=True), approx=True)

    ctx = jnp.einsum('hts,hsd->htd', p, v, preferred_element_type=f32)  # (H,BT,HD)

    # merge heads (lane concat) + single fused output projection
    ctx2 = jnp.concatenate([ctx[hh] for hh in range(H)], axis=-1)       # (BT, C)
    attn = jnp.dot(ctx2, wo, preferred_element_type=f32) + bo

    x = x + attn                                       # residual 1

    # ---------------- MLP branch ----------------
    h2 = _layernorm(x, ln2w, ln2b)
    ff = jnp.dot(h2, wfc, preferred_element_type=f32) + bfc   # (BT, 4C)
    ff = _gelu_exact(ff)
    ff = jnp.dot(ff, wpr, preferred_element_type=f32) + bpr   # (BT, C)

    out_ref[...] = (x + ff).astype(out_ref.dtype)      # residual 2


def pack_params(params):
    """One-time host-side packing of all Block parameters into a single
    (TOTAL_ROWS, 128) f32 slab.  Attention scale folded into the q columns."""
    (ln1_w, ln1_b, w_qkv, b_qkv, w_o, b_o,
     ln2_w, ln2_b, w_fc, b_fc, w_pr, b_pr) = params
    C = N_EMBD
    scale = 1.0 / (float(HEAD_DIM) ** 0.5)

    w_qkv = jnp.concatenate([w_qkv[:, :C] * scale, w_qkv[:, C:]], axis=1)
    b_qkv = jnp.concatenate([b_qkv[:, :C] * scale, b_qkv[:, C:]], axis=1)

    buf = jnp.zeros((TOTAL_ROWS, PACK_COLS), jnp.float32)
    buf = buf.at[ROW_LN1W, :C].set(ln1_w[0])
    buf = buf.at[ROW_LN1B, :C].set(ln1_b[0])
    buf = buf.at[ROW_BQKV, :3 * C].set(b_qkv[0])
    buf = buf.at[ROW_BO, :C].set(b_o[0])
    buf = buf.at[ROW_LN2W, :C].set(ln2_w[0])
    buf = buf.at[ROW_LN2B, :C].set(ln2_b[0])
    buf = buf.at[ROW_BFC, :4 * C].set(b_fc[0])
    buf = buf.at[ROW_BPR, :C].set(b_pr[0])
    buf = buf.at[ROW_WQKV:ROW_WQKV + C, :3 * C].set(w_qkv)
    buf = buf.at[ROW_WO:ROW_WO + C, :C].set(w_o)
    buf = buf.at[ROW_WFC:ROW_WFC + C, :4 * C].set(w_fc)
    buf = buf.at[ROW_WPR:ROW_WPR + 4 * C, :C].set(w_pr)
    return buf


@jax.jit
def gpt_block(x, packed):
    B, T, C = x.shape
    BT = B * T
    x2 = x.reshape(BT, C)                 # contiguous host-side reshape, free
    vmem = pl.BlockSpec(memory_space=pltpu.MemorySpace.VMEM)
    out2 = pl.pallas_call(
        functools.partial(block_kernel, seq_len=T),
        out_shape=jax.ShapeDtypeStruct((BT, C), x.dtype),
        in_specs=[vmem, vmem],            # grid-less: 2 DMAs, whole arrays in VMEM
        out_specs=vmem,
    )(x2, packed)
    return out2.reshape(B, T, C)


def init_params(key, n_embd):
    ks = jax.random.split(key, 4)
    std = 0.02
    f32 = jnp.float32

    ln1_w = jnp.ones((1, n_embd), f32)
    ln1_b = jnp.zeros((1, n_embd), f32)
    ln2_w = jnp.ones((1, n_embd), f32)
    ln2_b = jnp.zeros((1, n_embd), f32)

    # weights stored (in, out) so compute is plain h @ W
    w_qkv = std * jax.random.normal(ks[0], (n_embd, 3 * n_embd), f32)
    b_qkv = jnp.zeros((1, 3 * n_embd), f32)
    w_o = std * jax.random.normal(ks[1], (n_embd, n_embd), f32)
    b_o = jnp.zeros((1, n_embd), f32)
    w_fc = std * jax.random.normal(ks[2], (n_embd, 4 * n_embd), f32)
    b_fc = jnp.zeros((1, 4 * n_embd), f32)
    w_pr = std * jax.random.normal(ks[3], (4 * n_embd, n_embd), f32)
    b_pr = jnp.zeros((1, n_embd), f32)

    return (ln1_w, ln1_b, w_qkv, b_qkv, w_o, b_o,
            ln2_w, ln2_b, w_fc, b_fc, w_pr, b_pr)


def reference_block(x, params):
    # pure-JAX reference (matches the PyTorch Block forward, eval mode)
    (ln1_w, ln1_b, w_qkv, b_qkv, w_o, b_o,
     ln2_w, ln2_b, w_fc, b_fc, w_pr, b_pr) = params
    B, T, C = x.shape

    def ln(h, w, b):
        mu = jnp.mean(h, axis=-1, keepdims=True)
        var = jnp.mean((h - mu) ** 2, axis=-1, keepdims=True)
        return (h - mu) * jax.lax.rsqrt(var + LN_EPS) * w[0] + b[0]

    h = ln(x, ln1_w, ln1_b)
    qkv = h @ w_qkv + b_qkv[0]
    q, k, v = jnp.split(qkv, 3, axis=-1)
    q = q.reshape(B, T, N_HEAD, HEAD_DIM).transpose(0, 2, 1, 3)
    k = k.reshape(B, T, N_HEAD, HEAD_DIM).transpose(0, 2, 1, 3)
    v = v.reshape(B, T, N_HEAD, HEAD_DIM).transpose(0, 2, 1, 3)
    att = jnp.einsum("bhtd,bhsd->bhts", q, k) / jnp.sqrt(jnp.float32(HEAD_DIM))
    mask = jnp.tril(jnp.ones((T, T), bool))
    att = jnp.where(mask, att, NEG_INF)
    att = jax.nn.softmax(att, axis=-1)
    o = jnp.einsum("bhts,bhsd->bhtd", att, v).transpose(0, 2, 1, 3).reshape(B, T, C)
    x = x + o @ w_o + b_o[0]
    h2 = ln(x, ln2_w, ln2_b)
    ff = jax.nn.gelu(h2 @ w_fc + b_fc[0], approximate=False)
    return x + ff @ w_pr + b_pr[0]


if __name__ == "__main__":
    key = jax.random.PRNGKey(0)
    kx, kp = jax.random.split(key)
    x = jax.random.normal(kx, (BATCH, SEQ, N_EMBD), jnp.float32)
    params = init_params(kp, N_EMBD)

    # one-time weight prep/packing (hoisted out of the per-call path)
    packed = jax.block_until_ready(pack_params(params))

    out = jax.block_until_ready(gpt_block(x, packed))
    ref = reference_block(x, params)

    assert out.shape == (BATCH, SEQ, N_EMBD)
    assert jnp.allclose(out, ref, atol=2e-4, rtol=2e-4), \
        float(jnp.max(jnp.abs(out - ref)))
    print("KERNEL_OK")
</pallas_src>

<mosaic_0001>
module attributes {stable_mosaic.version = 11 : i64} {
  func.func @block_kernel(%arg0: memref<16x32xf32, #tpu.memory_space<vmem>>, %arg1: memref<232x128xf32, #tpu.memory_space<vmem>>, %arg2: memref<16x32xf32, #tpu.memory_space<vmem>>) attributes {dimension_semantics = [], scalar_prefetch = 0 : i64, scratch_operands = 0 : i64, tpu.core_type = #tpu.core_type<tc>} {
    %c0 = arith.constant 0 : index
    %c0_0 = arith.constant 0 : index
    %0 = vector.load %arg0[%c0, %c0_0] : memref<16x32xf32, #tpu.memory_space<vmem>>, vector<16x32xf32>
    %c0_1 = arith.constant 0 : index
    %c0_2 = arith.constant 0 : index
    %1 = vector.load %arg1[%c0_1, %c0_2] : memref<232x128xf32, #tpu.memory_space<vmem>>, vector<1x32xf32>
    %c1 = arith.constant 1 : index
    %c0_3 = arith.constant 0 : index
    %2 = vector.load %arg1[%c1, %c0_3] : memref<232x128xf32, #tpu.memory_space<vmem>>, vector<1x32xf32>
    %c2 = arith.constant 2 : index
    %c0_4 = arith.constant 0 : index
    %3 = vector.load %arg1[%c2, %c0_4] : memref<232x128xf32, #tpu.memory_space<vmem>>, vector<1x96xf32>
    %c3 = arith.constant 3 : index
    %c0_5 = arith.constant 0 : index
    %4 = vector.load %arg1[%c3, %c0_5] : memref<232x128xf32, #tpu.memory_space<vmem>>, vector<1x32xf32>
    %c4 = arith.constant 4 : index
    %c0_6 = arith.constant 0 : index
    %5 = vector.load %arg1[%c4, %c0_6] : memref<232x128xf32, #tpu.memory_space<vmem>>, vector<1x32xf32>
    %c5 = arith.constant 5 : index
    %c0_7 = arith.constant 0 : index
    %6 = vector.load %arg1[%c5, %c0_7] : memref<232x128xf32, #tpu.memory_space<vmem>>, vector<1x32xf32>
    %c6 = arith.constant 6 : index
    %c0_8 = arith.constant 0 : index
    %7 = vector.load %arg1[%c6, %c0_8] : memref<232x128xf32, #tpu.memory_space<vmem>>, vector<1x128xf32>
    %c7 = arith.constant 7 : index
    %c0_9 = arith.constant 0 : index
    %8 = vector.load %arg1[%c7, %c0_9] : memref<232x128xf32, #tpu.memory_space<vmem>>, vector<1x32xf32>
    %c8 = arith.constant 8 : index
    %c0_10 = arith.constant 0 : index
    %9 = vector.load %arg1[%c8, %c0_10] : memref<232x128xf32, #tpu.memory_space<vmem>>, vector<32x96xf32>
    %c40 = arith.constant 40 : index
    %c0_11 = arith.constant 0 : index
    %10 = vector.load %arg1[%c40, %c0_11] : memref<232x128xf32, #tpu.memory_space<vmem>>, vector<32x32xf32>
    %c72 = arith.constant 72 : index
    %c0_12 = arith.constant 0 : index
    %11 = vector.load %arg1[%c72, %c0_12] : memref<232x128xf32, #tpu.memory_space<vmem>>, vector<32x128xf32>
    %c104 = arith.constant 104 : index
    %c0_13 = arith.constant 0 : index
    %12 = vector.load %arg1[%c104, %c0_13] : memref<232x128xf32, #tpu.memory_space<vmem>>, vector<128x32xf32>
    %cst = arith.constant dense<0.000000e+00> : vector<16xf32>
    %13 = vector.multi_reduction <add>, %0, %cst [1] : vector<16x32xf32> to vector<16xf32>
    %14 = vector.shape_cast %13 : vector<16xf32> to vector<16x1xf32>
    %cst_14 = arith.constant 3.200000e+01 : f32
    %15 = vector.broadcast %cst_14 : f32 to vector<16x1xf32>
    %16 = arith.divf %14, %15 : vector<16x1xf32>
    %17 = vector.broadcast %16 : vector<16x1xf32> to vector<16x32xf32>
    %18 = arith.subf %0, %17 : vector<16x32xf32>
    %19 = arith.mulf %18, %18 : vector<16x32xf32>
    %cst_15 = arith.constant dense<0.000000e+00> : vector<16xf32>
    %20 = vector.multi_reduction <add>, %19, %cst_15 [1] : vector<16x32xf32> to vector<16xf32>
    %21 = vector.shape_cast %20 : vector<16xf32> to vector<16x1xf32>
    %cst_16 = arith.constant 3.200000e+01 : f32
    %22 = vector.broadcast %cst_16 : f32 to vector<16x1xf32>
    %23 = arith.divf %21, %22 : vector<16x1xf32>
    %24 = vector.broadcast %16 : vector<16x1xf32> to vector<16x32xf32>
    %25 = arith.subf %0, %24 : vector<16x32xf32>
    %cst_17 = arith.constant 9.99999974E-6 : f32
    %26 = vector.broadcast %cst_17 : f32 to vector<16x1xf32>
    %27 = arith.addf %23, %26 : vector<16x1xf32>
    %28 = math.rsqrt %27 : vector<16x1xf32>
    %29 = vector.broadcast %28 : vector<16x1xf32> to vector<16x32xf32>
    %30 = arith.mulf %25, %29 : vector<16x32xf32>
    %31 = vector.broadcast %1 : vector<1x32xf32> to vector<16x32xf32>
    %32 = arith.mulf %30, %31 : vector<16x32xf32>
    %33 = vector.broadcast %2 : vector<1x32xf32> to vector<16x32xf32>
    %34 = arith.addf %32, %33 : vector<16x32xf32>
    %cst_18 = arith.constant dense<0.000000e+00> : vector<16x96xf32>
    %35 = tpu.matmul %34, %9, %cst_18 {dimension_numbers = #tpu.dot_dimension_numbers<[1], [0], [0], [1], [0, 0, 1, 1], [], []>} : vector<16x32xf32>, vector<32x96xf32>, vector<16x96xf32> -> vector<16x96xf32>
    %36 = vector.broadcast %3 : vector<1x96xf32> to vector<16x96xf32>
    %37 = arith.addf %35, %36 : vector<16x96xf32>
    %38 = vector.extract_strided_slice %37 {offsets = [0, 0], sizes = [16, 8], strides = [1, 1]} : vector<16x96xf32> to vector<16x8xf32>
    %39 = vector.extract_strided_slice %37 {offsets = [0, 8], sizes = [16, 8], strides = [1, 1]} : vector<16x96xf32> to vector<16x8xf32>
    %40 = vector.extract_strided_slice %37 {offsets = [0, 16], sizes = [16, 8], strides = [1, 1]} : vector<16x96xf32> to vector<16x8xf32>
    %41 = vector.extract_strided_slice %37 {offsets = [0, 24], sizes = [16, 8], strides = [1, 1]} : vector<16x96xf32> to vector<16x8xf32>
    %42 = vector.shape_cast %38 : vector<16x8xf32> to vector<1x16x8xf32>
    %43 = vector.shape_cast %39 : vector<16x8xf32> to vector<1x16x8xf32>
    %44 = vector.shape_cast %40 : vector<16x8xf32> to vector<1x16x8xf32>
    %45 = vector.shape_cast %41 : vector<16x8xf32> to vector<1x16x8xf32>
    %46 = tpu.concatenate %42, %43, %44, %45 in 0 : vector<1x16x8xf32>, vector<1x16x8xf32>, vector<1x16x8xf32>, vector<1x16x8xf32> -> vector<4x16x8xf32>
    %47 = vector.extract_strided_slice %37 {offsets = [0, 32], sizes = [16, 8], strides = [1, 1]} : vector<16x96xf32> to vector<16x8xf32>
    %48 = vector.extract_strided_slice %37 {offsets = [0, 40], sizes = [16, 8], strides = [1, 1]} : vector<16x96xf32> to vector<16x8xf32>
    %49 = vector.extract_strided_slice %37 {offsets = [0, 48], sizes = [16, 8], strides = [1, 1]} : vector<16x96xf32> to vector<16x8xf32>
    %50 = vector.extract_strided_slice %37 {offsets = [0, 56], sizes = [16, 8], strides = [1, 1]} : vector<16x96xf32> to vector<16x8xf32>
    %51 = vector.shape_cast %47 : vector<16x8xf32> to vector<1x16x8xf32>
    %52 = vector.shape_cast %48 : vector<16x8xf32> to vector<1x16x8xf32>
    %53 = vector.shape_cast %49 : vector<16x8xf32> to vector<1x16x8xf32>
    %54 = vector.shape_cast %50 : vector<16x8xf32> to vector<1x16x8xf32>
    %55 = tpu.concatenate %51, %52, %53, %54 in 0 : vector<1x16x8xf32>, vector<1x16x8xf32>, vector<1x16x8xf32>, vector<1x16x8xf32> -> vector<4x16x8xf32>
    %56 = vector.extract_strided_slice %37 {offsets = [0, 64], sizes = [16, 8], strides = [1, 1]} : vector<16x96xf32> to vector<16x8xf32>
    %57 = vector.extract_strided_slice %37 {offsets = [0, 72], sizes = [16, 8], strides = [1, 1]} : vector<16x96xf32> to vector<16x8xf32>
    %58 = vector.extract_strided_slice %37 {offsets = [0, 80], sizes = [16, 8], strides = [1, 1]} : vector<16x96xf32> to vector<16x8xf32>
    %59 = vector.extract_strided_slice %37 {offsets = [0, 88], sizes = [16, 8], strides = [1, 1]} : vector<16x96xf32> to vector<16x8xf32>
    %60 = vector.shape_cast %56 : vector<16x8xf32> to vector<1x16x8xf32>
    %61 = vector.shape_cast %57 : vector<16x8xf32> to vector<1x16x8xf32>
    %62 = vector.shape_cast %58 : vector<16x8xf32> to vector<1x16x8xf32>
    %63 = vector.shape_cast %59 : vector<16x8xf32> to vector<1x16x8xf32>
    %64 = tpu.concatenate %60, %61, %62, %63 in 0 : vector<1x16x8xf32>, vector<1x16x8xf32>, vector<1x16x8xf32>, vector<1x16x8xf32> -> vector<4x16x8xf32>
    "tpu.trace_start"() <{level = 10 : i32, message = "htd,hsd->hts"}> : () -> ()
    %cst_19 = arith.constant dense<0.000000e+00> : vector<4x16x16xf32>
    %65 = tpu.matmul %46, %55, %cst_19 {dimension_numbers = #tpu.dot_dimension_numbers<[2], [2], [1], [1], [0, 0, 0, 1, 1, 1], [0], [0]>} : vector<4x16x8xf32>, vector<4x16x8xf32>, vector<4x16x16xf32> -> vector<4x16x16xf32>
    "tpu.trace_stop"() : () -> ()
    %66 = tpu.iota {dimensions = array<i32: 0>} : vector<16x16xi32>
    %67 = tpu.iota {dimensions = array<i32: 1>} : vector<16x16xi32>
    %c0_i32 = arith.constant 0 : i32
    %68 = vector.broadcast %c0_i32 : i32 to vector<16x16xi32>
    %69 = arith.cmpi sge, %66, %68 : vector<16x16xi32>
    %c8_i32 = arith.constant 8 : i32
    %70 = vector.broadcast %c8_i32 : i32 to vector<16x16xi32>
    %71 = arith.cmpi slt, %66, %70 : vector<16x16xi32>
    %72 = arith.andi %69, %71 : vector<16x16xi1>
    %c0_i32_20 = arith.constant 0 : i32
    %73 = vector.broadcast %c0_i32_20 : i32 to vector<16x16xi32>
    %74 = arith.cmpi sge, %67, %73 : vector<16x16xi32>
    %75 = arith.andi %72, %74 : vector<16x16xi1>
    %c8_i32_21 = arith.constant 8 : i32
    %76 = vector.broadcast %c8_i32_21 : i32 to vector<16x16xi32>
    %77 = arith.cmpi slt, %67, %76 : vector<16x16xi32>
    %78 = arith.andi %75, %77 : vector<16x16xi1>
    %c8_i32_22 = arith.constant 8 : i32
    %79 = vector.broadcast %c8_i32_22 : i32 to vector<16x16xi32>
    %80 = arith.cmpi sge, %66, %79 : vector<16x16xi32>
    %c16_i32 = arith.constant 16 : i32
    %81 = vector.broadcast %c16_i32 : i32 to vector<16x16xi32>
    %82 = arith.cmpi slt, %66, %81 : vector<16x16xi32>
    %83 = arith.andi %80, %82 : vector<16x16xi1>
    %c8_i32_23 = arith.constant 8 : i32
    %84 = vector.broadcast %c8_i32_23 : i32 to vector<16x16xi32>
    %85 = arith.cmpi sge, %67, %84 : vector<16x16xi32>
    %86 = arith.andi %83, %85 : vector<16x16xi1>
    %c16_i32_24 = arith.constant 16 : i32
    %87 = vector.broadcast %c16_i32_24 : i32 to vector<16x16xi32>
    %88 = arith.cmpi slt, %67, %87 : vector<16x16xi32>
    %89 = arith.andi %86, %88 : vector<16x16xi1>
    %90 = arith.ori %78, %89 : vector<16x16xi1>
    %91 = arith.cmpi sge, %66, %67 : vector<16x16xi32>
    %92 = arith.andi %91, %90 : vector<16x16xi1>
    %93 = vector.shape_cast %92 : vector<16x16xi1> to vector<1x16x16xi1>
    %cst_25 = arith.constant -1.000000e+30 : f32
    %94 = vector.shape_cast %93 : vector<1x16x16xi1> to vector<1x16x16xi1>
    %95 = vector.broadcast %94 : vector<1x16x16xi1> to vector<4x16x16xi1>
    %96 = vector.broadcast %cst_25 : f32 to vector<4x16x16xf32>
    %97 = arith.select %95, %65, %96 : vector<4x16x16xi1>, vector<4x16x16xf32>
    %cst_26 = arith.constant dense<0xFF800000> : vector<4x16xf32>
    %98 = vector.multi_reduction <maximumf>, %97, %cst_26 [2] : vector<4x16x16xf32> to vector<4x16xf32>
    %99 = vector.shape_cast %98 : vector<4x16xf32> to vector<4x16x1xf32>
    %100 = vector.broadcast %99 : vector<4x16x1xf32> to vector<4x16x16xf32>
    %101 = arith.subf %97, %100 : vector<4x16x16xf32>
    %102 = math.exp %101 : vector<4x16x16xf32>
    %cst_27 = arith.constant dense<0.000000e+00> : vector<4x16xf32>
    %103 = vector.multi_reduction <add>, %102, %cst_27 [2] : vector<4x16x16xf32> to vector<4x16xf32>
    %104 = vector.shape_cast %103 : vector<4x16xf32> to vector<4x16x1xf32>
    %105 = tpu.reciprocal %104 {approx = true} : vector<4x16x1xf32> -> vector<4x16x1xf32>
    %106 = vector.broadcast %105 : vector<4x16x1xf32> to vector<4x16x16xf32>
    %107 = arith.mulf %102, %106 : vector<4x16x16xf32>
    "tpu.trace_start"() <{level = 10 : i32, message = "hts,hsd->htd"}> : () -> ()
    %cst_28 = arith.constant dense<0.000000e+00> : vector<4x16x8xf32>
    %108 = tpu.matmul %107, %64, %cst_28 {dimension_numbers = #tpu.dot_dimension_numbers<[2], [1], [1], [2], [0, 0, 0, 1, 1, 2], [0], [0]>} : vector<4x16x16xf32>, vector<4x16x8xf32>, vector<4x16x8xf32> -> vector<4x16x8xf32>
    "tpu.trace_stop"() : () -> ()
    %109 = vector.extract_strided_slice %108 {offsets = [0, 0, 0], sizes = [1, 16, 8], strides = [1, 1, 1]} : vector<4x16x8xf32> to vector<1x16x8xf32>
    %110 = vector.shape_cast %109 : vector<1x16x8xf32> to vector<16x8xf32>
    %111 = vector.extract_strided_slice %108 {offsets = [1, 0, 0], sizes = [1, 16, 8], strides = [1, 1, 1]} : vector<4x16x8xf32> to vector<1x16x8xf32>
    %112 = vector.shape_cast %111 : vector<1x16x8xf32> to vector<16x8xf32>
    %113 = vector.extract_strided_slice %108 {offsets = [2, 0, 0], sizes = [1, 16, 8], strides = [1, 1, 1]} : vector<4x16x8xf32> to vector<1x16x8xf32>
    %114 = vector.shape_cast %113 : vector<1x16x8xf32> to vector<16x8xf32>
    %115 = vector.extract_strided_slice %108 {offsets = [3, 0, 0], sizes = [1, 16, 8], strides = [1, 1, 1]} : vector<4x16x8xf32> to vector<1x16x8xf32>
    %116 = vector.shape_cast %115 : vector<1x16x8xf32> to vector<16x8xf32>
    %117 = tpu.concatenate %110, %112, %114, %116 in 1 : vector<16x8xf32>, vector<16x8xf32>, vector<16x8xf32>, vector<16x8xf32> -> vector<16x32xf32>
    %cst_29 = arith.constant dense<0.000000e+00> : vector<16x32xf32>
    %118 = tpu.matmul %117, %10, %cst_29 {dimension_numbers = #tpu.dot_dimension_numbers<[1], [0], [0], [1], [0, 0, 1, 1], [], []>} : vector<16x32xf32>, vector<32x32xf32>, vector<16x32xf32> -> vector<16x32xf32>
    %119 = vector.broadcast %4 : vector<1x32xf32> to vector<16x32xf32>
    %120 = arith.addf %118, %119 : vector<16x32xf32>
    %121 = arith.addf %0, %120 : vector<16x32xf32>
    %cst_30 = arith.constant dense<0.000000e+00> : vector<16xf32>
    %122 = vector.multi_reduction <add>, %121, %cst_30 [1] : vector<16x32xf32> to vector<16xf32>
    %123 = vector.shape_cast %122 : vector<16xf32> to vector<16x1xf32>
    %cst_31 = arith.constant 3.200000e+01 : f32
    %124 = vector.broadcast %cst_31 : f32 to vector<16x1xf32>
    %125 = arith.divf %123, %124 : vector<16x1xf32>
    %126 = vector.broadcast %125 : vector<16x1xf32> to vector<16x32xf32>
    %127 = arith.subf %121, %126 : vector<16x32xf32>
    %128 = arith.mulf %127, %127 : vector<16x32xf32>
    %cst_32 = arith.constant dense<0.000000e+00> : vector<16xf32>
    %129 = vector.multi_reduction <add>, %128, %cst_32 [1] : vector<16x32xf32> to vector<16xf32>
    %130 = vector.shape_cast %129 : vector<16xf32> to vector<16x1xf32>
    %cst_33 = arith.constant 3.200000e+01 : f32
    %131 = vector.broadcast %cst_33 : f32 to vector<16x1xf32>
    %132 = arith.divf %130, %131 : vector<16x1xf32>
    %133 = vector.broadcast %125 : vector<16x1xf32> to vector<16x32xf32>
    %134 = arith.subf %121, %133 : vector<16x32xf32>
    %cst_34 = arith.constant 9.99999974E-6 : f32
    %135 = vector.broadcast %cst_34 : f32 to vector<16x1xf32>
    %136 = arith.addf %132, %135 : vector<16x1xf32>
    %137 = math.rsqrt %136 : vector<16x1xf32>
    %138 = vector.broadcast %137 : vector<16x1xf32> to vector<16x32xf32>
    %139 = arith.mulf %134, %138 : vector<16x32xf32>
    %140 = vector.broadcast %5 : vector<1x32xf32> to vector<16x32xf32>
    %141 = arith.mulf %139, %140 : vector<16x32xf32>
    %142 = vector.broadcast %6 : vector<1x32xf32> to vector<16x32xf32>
    %143 = arith.addf %141, %142 : vector<16x32xf32>
    %cst_35 = arith.constant dense<0.000000e+00> : vector<16x128xf32>
    %144 = tpu.matmul %143, %11, %cst_35 {dimension_numbers = #tpu.dot_dimension_numbers<[1], [0], [0], [1], [0, 0, 1, 1], [], []>} : vector<16x32xf32>, vector<32x128xf32>, vector<16x128xf32> -> vector<16x128xf32>
    %145 = vector.broadcast %7 : vector<1x128xf32> to vector<16x128xf32>
    %146 = arith.addf %144, %145 : vector<16x128xf32>
    %cst_36 = arith.constant 5.000000e-01 : f32
    %147 = vector.broadcast %cst_36 : f32 to vector<16x128xf32>
    %148 = arith.mulf %147, %146 : vector<16x128xf32>
    %cst_37 = arith.constant 2.000000e+00 : f32
    %149 = math.sqrt %cst_37 : f32
    %cst_38 = arith.constant 1.000000e+00 : f32
    %150 = arith.divf %cst_38, %149 : f32
    %151 = vector.broadcast %150 : f32 to vector<16x128xf32>
    %152 = arith.mulf %146, %151 : vector<16x128xf32>
    %153 = math.erf %152 : vector<16x128xf32>
    %cst_39 = arith.constant 1.000000e+00 : f32
    %154 = vector.broadcast %cst_39 : f32 to vector<16x128xf32>
    %155 = arith.addf %154, %153 : vector<16x128xf32>
    %156 = arith.mulf %148, %155 : vector<16x128xf32>
    %cst_40 = arith.constant dense<0.000000e+00> : vector<16x32xf32>
    %157 = tpu.matmul %156, %12, %cst_40 {dimension_numbers = #tpu.dot_dimension_numbers<[1], [0], [0], [1], [0, 0, 1, 1], [], []>} : vector<16x128xf32>, vector<128x32xf32>, vector<16x32xf32> -> vector<16x32xf32>
    %158 = vector.broadcast %8 : vector<1x32xf32> to vector<16x32xf32>
    %159 = arith.addf %157, %158 : vector<16x32xf32>
    %160 = arith.addf %121, %159 : vector<16x32xf32>
    %c0_41 = arith.constant 0 : index
    %c0_42 = arith.constant 0 : index
    %161 = vector.load %arg2[%c0_41, %c0_42] : memref<16x32xf32, #tpu.memory_space<vmem>>, vector<16x32xf32>
    tpu.vector_store %arg2[%c0_41, %c0_42], %160 {strides = array<i32>} : memref<16x32xf32, #tpu.memory_space<vmem>>, vector<16x32xf32>,
    return
  }
}

</mosaic_0001>

<bundles_post_ra>
// kernel: gpt_block.1
= control target key start
LH: loop header
LB: loop body
LE: loop exit
PB: predicated region body
PF: predicated region fallthrough
CT: control target
= control target key end

     0   :  { %7 = vsyncpa [#allocation3], 0  ;;  %s2128_s0 = inlined_call_operand.hbm [shape: f32[16,32], index: 0, kind: input, shape index: {}]   ;;  %s2129_s1 = inlined_call_operand.hbm [shape: f32[232,128], index: 1, kind: input, shape index: {}]   ;;  %s2130_s2 = inlined_call_operand.hbm [shape: f32[16,32], index: 2, kind: output, shape index: {}]  }
   0x1   :  { %8 = vsyncpa [#allocation6], 0 }
   0x2   :  { %9 = vsyncpa [#allocation4], 0  ;;  %s1896_s9 = smov [#allocation2]   ;;  %s1824_s13 = scalar_lea.hbm %s2128_s0, 256 }
   0x3   :  { %s15_s10 = sshll.u32 %s1896_s9, 4  ;;  %p1825_p0 = scmp.ne.s32.totalorder %s2128_s0, %s1824_s13  ;;  %s16_s10 = int_to_ptr.vmem [resolvable:$true] %s15_s10 }
   0x4   :  { %p1828_p1 = scmp.lt.u32.totalorder %s1824_s13, %s2128_s0 }
   0x6   :  { %p1830_p2 = pnand %p1828_p1, %p1825_p0 }
   0x8   :  { %1833 = shalt.err (!%p1830_p2)
}
   0x9   :  { %s1834_s18 = scalar_lea.vmem %s16_s10, 256  ;;  %p1839_p4 = scmp.lt.s32.totalorder %s16_s10, %s16_s10 }
   0xa   :  { %p1835_p3 = scmp.ne.s32.totalorder %s16_s10, %s1834_s18  ;;  %p1840_p5 = scmp.lt.s32.totalorder %s1834_s18, %s1834_s18 }
   0xc   :  { %p1841_p6 = por %p1840_p5, %p1839_p4 }
   0xe   :  { %p1842_p7 = pnand %p1841_p6, %p1835_p3 }
  0x10   :  { %1845 = shalt.err (!%p1842_p7)
}
  0x11   :  { %s1897_s19 = smov 128   ;;  %s1898_s20 = smov 8  }
  0x12   :  { %21 = dma.hbm_to_vmem [thread:$0]  %s2128_s0, 256, %s16_s10, [#allocation3], %s1897_s19, %s1897_s19, %s1898_s20  }
  0x13   :  { %s1899_s23 = smov [#allocation5]   ;;  %s1846_s27 = scalar_lea.hbm %s2129_s1, 3712 }
  0x14   :  { %s27_s24 = sshll.u32 %s1899_s23, 4  ;;  %p1847_p8 = scmp.ne.s32.totalorder %s2129_s1, %s1846_s27  ;;  %s28_s24 = int_to_ptr.vmem [resolvable:$true] %s27_s24 }
  0x15   :  { %p1850_p9 = scmp.lt.u32.totalorder %s1846_s27, %s2129_s1 }
  0x17   :  { %p1852_p10 = pnand %p1850_p9, %p1847_p8 }
  0x19   :  { %1855 = shalt.err (!%p1852_p10)
}
  0x1a   :  { %s1856_s4 = scalar_lea.vmem %s28_s24, 3712  ;;  %p1861_p12 = scmp.lt.s32.totalorder %s28_s24, %s28_s24 }
  0x1b   :  { %p1857_p11 = scmp.ne.s32.totalorder %s28_s24, %s1856_s4  ;;  %p1862_p13 = scmp.lt.s32.totalorder %s1856_s4, %s1856_s4 }
  0x1d   :  { %p1863_p0 = por %p1862_p13, %p1861_p12 }
  0x1f   :  { %p1864_p1 = pnand %p1863_p0, %p1857_p11 }
  0x21   :  { %1867 = shalt.err (!%p1864_p1)
}
  0x22   :  { %33 = dma.hbm_to_vmem [thread:$0]  %s2129_s1, 3712, %s28_s24, [#allocation6], %s1897_s19, %s1897_s19, %s1898_s20  }
  0x23   :  { %1890 = dma.done.wait [#allocation3], 256  }
  0x24   :  { %1891 = vsyncadd [#allocation3], 4294967040 }
  0x25   :  { %1892 = dma.done.wait [#allocation6], 3712  }
  0x26   :  { %1893 = vsyncadd [#allocation6], 4294963584  ;;  %vm78_vm0 = vcmask 261120   ;;  %v1953_v0 = vld [vmem:[#allocation2] sm:$0xff]  ;;  %v1955_v1 = vld [vmem:[#allocation2 + $0x8] sm:$0xff]  ;;  %vm221_vm1 = vcmask 64512  }
  0x27   :  { %v79_v2 = vsel %vm78_vm0, %v1953_v0, 0.0  ;;  %v82_v3 = vsel %vm78_vm0, %v1955_v1, 0.0  ;;  %v50_v14 = vld [vmem:[#allocation5 + $0x8] sm:$0xff]  ;;  %v51_v15 = vld [vmem:[#allocation5 + $0x10] sm:$0xff]  ;;  %v52_v16 = vld [vmem:[#allocation5 + $0x18] sm:$0xff]  ;;  %s1900_s1 = smov 120  }
  0x28   :  { %80 = vadd.xlane.f32.xlu0 %v79_v2  ;;  %v1632_v17 = vpack.c.bf16 %v51_v15, %v50_v14  ;;  %v53_v18 = vld [vmem:[#allocation5 + $0x20] sm:$0xff]  ;;  %s1901_s6 = smov 112   ;;  %s1902_s7 = smov 104   ;;  %vm1980_vm2 = vmpackc.low %vm221_vm1, %vm221_vm1  ;;  %vm613_vm11 = vcmask 130048   ;;  %vm1078_vm12 = vcmask 195584  }
  0x29   :  { %v1636_v19 = vpack.c.bf16 %v53_v18, %v52_v16  ;;  %v1402_v27 = vld [vmem:[#allocation5] ss:$0 sm:$0xff]  ;;  %v1403_v29 = vld [vmem:[#allocation5 + $0x1] ss:$0 sm:$0xff]  ;;  %v1404_v36 = vld [vmem:[#allocation5 + $0x2] ss:$0 sm:$0xff] }
  0x2a   :  { %1633 = vmatprep.subr.bf16.mxu1 %v1632_v17  ;;  %s1903_s8 = smov 96   ;;  %s1904_s9 = smov 64  }
  0x2b   :  { %1635 = vmatpush3.bf16.msra.mxu1 %v1632_v17  ;;  %s1905_s10 = smov 16   ;;  %s1906_s11 = smov 24  }
  0x2c   :  { %83 = vadd.xlane.f32.xlu0 %v82_v3  ;;  %1637 = vmatprep.subr.bf16.mxu1 %v1636_v19  ;;  %s1907_s12 = smov [#allocation7]  }
  0x2d   :  { %s1389_s13 = sshll.u32 %s1907_s12, 4  ;;  %s1390_s13 = int_to_ptr.vmem [resolvable:$true] %s1389_s13 }
  0x2e   :  { %s1868_s14 = scalar_lea.vmem %s1390_s13, 256  ;;  %p1873_p3 = scmp.lt.s32.totalorder %s1390_s13, %s1390_s13 }
  0x2f   :  { %1639 = vmatpush3.bf16.msra.mxu1 %v1636_v19  ;;  %p1869_p2 = scmp.ne.s32.totalorder %s1390_s13, %s1868_s14  ;;  %p1874_p4 = scmp.lt.s32.totalorder %s1868_s14, %s1868_s14 }
  0x31   :  { %p1875_p5 = por %p1874_p4, %p1873_p3 }
  0x33   :  { %p1876_p6 = pnand %p1875_p5, %p1869_p2 }
  0xb5   :  { %v81_v4 = vpop.xlane.xlu0 %80 }
  0xb6   :  { %v86_v5 = vmul.f32 0.03125, %v81_v4 }
  0xb8   :  { %v88_v6 = vsub.f32 %v1953_v0, %v86_v5 }
  0xb9   :  { %v84_v7 = vpop.xlane.xlu0 %83 }
  0xba   :  { %v87_v8 = vmul.f32 0.03125, %v84_v7  ;;  %v90_v9 = vmul.f32 %v88_v6, %v88_v6 }
  0xbc   :  { %v89_v10 = vsub.f32 %v1955_v1, %v87_v8  ;;  %v92_v11 = vsel %vm78_vm0, %v90_v9, 0.0 }
  0xbd   :  { %93 = vadd.xlane.f32.xlu1 %v92_v11 }
  0xbe   :  { %v91_v12 = vmul.f32 %v89_v10, %v89_v10 }
  0xc0   :  { %v95_v13 = vsel %vm78_vm0, %v91_v12, 0.0 }
  0xc1   :  { %96 = vadd.xlane.f32.xlu1 %v95_v13 }
 0x14a   :  { %v94_v20 = vpop.xlane.xlu1 %93 }
 0x14b   :  { %v98_v21 = vmul.f32 0.03125, %v94_v20 }
 0x14d   :  { %v100_v22 = vadd.f32 1e-05, %v98_v21 }
 0x14e   :  { %v97_v23 = vpop.xlane.xlu1 %96 }
 0x14f   :  { %1780 = vrsqrt.f32 %v100_v22  ;;  %v99_v24 = vmul.f32 0.03125, %v97_v23 }
 0x151   :  { %v101_v25 = vadd.f32 1e-05, %v99_v24 }
 0x153   :  { %1782 = vrsqrt.f32 %v101_v25 }
 0x159   :  { %v1781_v26 = vpop.eup %1780 }
 0x15a   :  { %v104_v28 = vmul.f32 %v1781_v26, %v88_v6  ;;  %v566_v6 = vlaneseq }
 0x15c   :  { %v110_v30 = vmul.f32 %v1402_v27, %v104_v28  ;;  %v567_v7 = vshrl.u32 %v566_v6, 7  ;;  %v570_v8 = vand.u32 127, %v566_v6 }
 0x15d   :  { %v1783_v31 = vpop.eup %1782 }
 0x15e   :  { %v105_v32 = vmul.f32 %v1783_v31, %v89_v10  ;;  %v116_v33 = vadd.f32 %v1403_v29, %v110_v30  ;;  %v568_v9 = vadd.s32 8, %v567_v7  ;;  %vm589_vm3 = vcmp.ge.s32.totalorder %v570_v8, 8 }
 0x15f   :  { %vm592_vm4 = vcmp.lt.s32.totalorder %v570_v8, 16  ;;  %vm580_vm7 = vcmp.lt.s32.totalorder %v570_v8, 8  ;;  %vm597_vm8 = vcmp.ge.s32.totalorder %v567_v7, %v570_v8 }
 0x160   :  { %v111_v34 = vmul.f32 %v1402_v27, %v105_v32  ;;  %1516 = vmatprep.mubr.msk.f32.mxu1 %vm78_vm0, %v116_v33  ;;  %vm594_vm5 = vmand %vm589_vm3, %vm592_vm4  ;;  %vm598_vm6 = vcmp.ge.s32.totalorder %v568_v9, %v570_v8 }
 0x161   :  { %vm2009_vm9 = vmand %vm598_vm6, %vm594_vm5 }
 0x162   :  { %v117_v35 = vadd.f32 %v1403_v29, %v111_v34  ;;  %vm2013_vm10 = vmand %vm597_vm8, %vm580_vm7 }
 0x164   :  { %1517 = vmatmul.mubr.msk.f32.vlgmr.msra.gmra.mrb[0].mxu1 %vm78_vm0, %v117_v35 }
 0x237   :  { %v1518_v37 = vpop.f32.mrb[0].mxu1 }
 0x238   :  { %v200_v38 = vadd.f32 %v1518_v37, %v1404_v36  ;;  %v194_v39 = vpop.f32.mrb[1].mxu1 }
 0x239   :  { %v195_v40 = vadd.f32 %v1404_v36, %v194_v39 }
 0x23a   :  { %207 = vrot.lane.b32.xlu1 %v200_v38, %s1900_s1 }
 0x23b   :  { %205 = vrot.lane.b32.xlu0 %v195_v40, %s1900_s1  ;;  %1523 = vmatprep.mubr.msk.f32.mxu1 %vm221_vm1, %v195_v40  ;;  %v1968_v41 = vpack.i.bf16 %v200_v38, %v195_v40 }
 0x23e   :  { %211 = vrot.lane.b32.xlu1 %v200_v38, %s1901_s6 }
 0x23f   :  { %213 = vrot.lane.b32.xlu0 %v195_v40, %s1902_s7 }
 0x242   :  { %209 = vrot.lane.b32.xlu1 %v195_v40, %s1901_s6 }
 0x243   :  { %1741 = vrot.lane.b32.xlu0 %v1968_v41, %s1903_s8 }
 0x246   :  { %215 = vrot.lane.b32.xlu1 %v200_v38, %s1902_s7 }
 0x2ac   :  { %v208_v42 = vpop.permute.xlu1 %207 }
 0x2ad   :  { %v206_v43 = vpop.permute.xlu0 %205 }
 0x2ae   :  { %v1971_v44 = vpack.i.bf16 %v208_v42, %v206_v43 }
 0x2b0   :  { %v212_v45 = vpop.permute.xlu1 %211  ;;  %1746 = vrot.lane.b32.xlu1 %v1971_v44, %s1903_s8 }
 0x2b1   :  { %v214_v46 = vpop.permute.xlu0 %213 }
 0x2b2   :  { %1544 = vmatprep.mubr.msk.f32.mxu0 %vm221_vm1, %v214_v46 }
 0x2b4   :  { %v210_v47 = vpop.permute.xlu1 %209 }
 0x2b5   :  { %v1975_v48 = vpack.i.bf16 %v212_v45, %v210_v47  ;;  %v1742_v49 = vpop.permute.xlu0 %1741 }
 0x2b6   :  { %v1744_v50 = vunpack.i.h.bf16 %v1742_v49  ;;  %v1743_v51 = vunpack.i.l.bf16 %v1742_v49 }
 0x2b7   :  { %1751 = vrot.lane.b32.xlu0 %v1975_v48, %s1903_s8 }
 0x2b8   :  { %v1640_v53 = vpack.c.bf16 %v1744_v50, %v1743_v51  ;;  %v216_v54 = vpop.permute.xlu1 %215 }
 0x2b9   :  { %v1984_v55 = vpack.i.bf16 %v216_v54, %v214_v46 }
 0x2ba   :  { %1642 = vmatprep.subr.msk.bf16.mxu1 %vm1980_vm2, %v1640_v53 }
 0x2bb   :  { %1756 = vrot.lane.b32.xlu1 %v1984_v55, %s1903_s8  ;;  %1645 = vmatpush3.bf16.xpose.msk.msra.mxu1 %vm1980_vm2, %v1640_v53 }
 0x2c2   :  { %1524 = vmatmul.mubr.msk.f32.vlgmr.msra.gmra.mrb[2].mxu1 %vm221_vm1, %v200_v38 }
 0x2c3   :  { %1530 = vmatprep.mubr.msk.f32.mxu1 %vm221_vm1, %v206_v43 }
 0x322   :  { %v1747_v56 = vpop.permute.xlu1 %1746 }
 0x323   :  { %v1749_v57 = vunpack.i.h.bf16 %v1747_v56  ;;  %v1748_v58 = vunpack.i.l.bf16 %v1747_v56 }
 0x325   :  { %v1646_v59 = vpack.c.bf16 %v1749_v57, %v1748_v58 }
 0x327   :  { %1648 = vmatprep.subr.msk.bf16.mxu1 %vm1980_vm2, %v1646_v59 }
 0x328   :  { %1651 = vmatpush3.bf16.xpose.msk.msra.mxu1 %vm1980_vm2, %v1646_v59 }
 0x329   :  { %v1752_v60 = vpop.permute.xlu0 %1751 }
 0x32a   :  { %v1754_v61 = vunpack.i.h.bf16 %v1752_v60  ;;  %v1753_v62 = vunpack.i.l.bf16 %v1752_v60 }
 0x32c   :  { %v1652_v63 = vpack.c.bf16 %v1754_v61, %v1753_v62 }
 0x32d   :  { %v1757_v2 = vpop.permute.xlu1 %1756 }
 0x32e   :  { %v1759_v3 = vunpack.i.h.bf16 %v1757_v2  ;;  %v1758_v4 = vunpack.i.l.bf16 %v1757_v2  ;;  %1654 = vmatprep.subr.msk.bf16.mxu1 %vm1980_vm2, %v1652_v63 }
 0x32f   :  { %1531 = vmatmul.mubr.msk.f32.vlgmr.msra.gmra.mrb[4].mxu1 %vm221_vm1, %v208_v42 }
 0x330   :  { %1657 = vmatpush3.bf16.xpose.msk.msra.mxu1 %vm1980_vm2, %v1652_v63  ;;  %1537 = vmatprep.mubr.msk.f32.mxu1 %vm221_vm1, %v210_v47  ;;  %v1658_v5 = vpack.c.bf16 %v1759_v3, %v1758_v4 }
 0x332   :  { %1660 = vmatprep.subr.msk.bf16.mxu0 %vm1980_vm2, %v1658_v5 }
 0x333   :  { %1663 = vmatpush3.bf16.xpose.msk.msra.mxu0 %vm1980_vm2, %v1658_v5 }
 0x337   :  { %1538 = vmatmul.mubr.msk.f32.vlgmr.msra.gmra.mrb[6].mxu1 %vm221_vm1, %v212_v45 }
 0x33a   :  { %1545 = vmatmul.mubr.msk.f32.vlgmr.msra.gmra.mrb[0].mxu0 %vm221_vm1, %v216_v54 }
 0x395   :  { %v1525_v12 = vpop.f32.mrb[2].mxu1 }
 0x396   :  { %v606_v13 = vsel %vm2009_vm9, %v1525_v12, -1e+30  ;;  %v296_v14 = vpop.f32.mrb[3].mxu1 }
 0x397   :  { %v605_v15 = vsel %vm2013_vm10, %v296_v14, -1e+30  ;;  %v617_v16 = vsel %vm613_vm11, %v606_v13, -inf }
 0x398   :  { %618 = vmax.xlane.f32.xlu1 %v617_v16  ;;  %v614_v17 = vsel %vm613_vm11, %v605_v15, -inf }
 0x399   :  { %615 = vmax.xlane.f32.xlu0 %v614_v17 }
 0x402   :  { %v1532_v18 = vpop.f32.mrb[4].mxu1 }
 0x403   :  { %v608_v19 = vsel %vm2009_vm9, %v1532_v18, -1e+30  ;;  %v383_v20 = vpop.f32.mrb[5].mxu1 }
 0x404   :  { %v623_v21 = vsel %vm613_vm11, %v608_v19, -inf  ;;  %v607_v22 = vsel %vm2013_vm10, %v383_v20, -1e+30 }
 0x405   :  { %624 = vmax.xlane.f32.xlu0 %v623_v21  ;;  %v620_v23 = vsel %vm613_vm11, %v607_v22, -inf }
 0x409   :  { %621 = vmax.xlane.f32.xlu0 %v620_v23 }
 0x40a   :  { %v1539_v24 = vpop.f32.mrb[6].mxu1 }
 0x40b   :  { %v610_v25 = vsel %vm2009_vm9, %v1539_v24, -1e+30  ;;  %v470_v26 = vpop.f32.mrb[7].mxu1 }
 0x40c   :  { %v609_v27 = vsel %vm2013_vm10, %v470_v26, -1e+30  ;;  %v629_v28 = vsel %vm613_vm11, %v610_v25, -inf }
 0x40d   :  { %v1546_v29 = vpop.f32.mrb[0].mxu0  ;;  %630 = vmax.xlane.f32.xlu1 %v629_v28  ;;  %v626_v30 = vsel %vm613_vm11, %v609_v27, -inf }
 0x40e   :  { %v612_v31 = vsel %vm2009_vm9, %v1546_v29, -1e+30  ;;  %v557_v32 = vpop.f32.mrb[1].mxu0  ;;  %627 = vmax.xlane.f32.xlu0 %v626_v30 }
 0x40f   :  { %v611_v33 = vsel %vm2013_vm10, %v557_v32, -1e+30  ;;  %v635_v34 = vsel %vm613_vm11, %v612_v31, -inf }
 0x410   :  { %v632_v35 = vsel %vm613_vm11, %v611_v33, -inf }
 0x411   :  { %636 = vmax.xlane.f32.xlu1 %v635_v34 }
 0x412   :  { %633 = vmax.xlane.f32.xlu0 %v632_v35 }
 0x425   :  { %v619_v36 = vpop.xlane.xlu1 %618 }
 0x426   :  { %v639_v37 = vsub.f32 %v606_v13, %v619_v36  ;;  %v616_v38 = vpop.xlane.xlu0 %615 }
 0x427   :  { %v638_v39 = vsub.f32 %v605_v15, %v616_v38 }
 0x428   :  { %v648_v40 = vmul.f32 1.442695, %v639_v37 }
 0x429   :  { %v646_v42 = vmul.f32 1.442695, %v638_v39 }
 0x42a   :  { %1784 = vpow2.f32 %v648_v40 }
 0x42b   :  { %1786 = vpow2.f32 %v646_v42 }
 0x434   :  { %v2041_v43 = vpop.eup %1784 }
 0x435   :  { %v1787_v45 = vpop.eup %1786  ;;  %v665_v46 = vsel %vm613_vm11, %v2041_v43, 0.0 }
 0x436   :  { %666 = vadd.xlane.f32.xlu1 %v665_v46  ;;  %v662_v47 = vsel %vm613_vm11, %v1787_v45, 0.0 }
 0x437   :  { %663 = vadd.xlane.f32.xlu0 %v662_v47 }
 0x492   :  { %v625_v49 = vpop.xlane.xlu0 %624 }
 0x493   :  { %v641_v50 = vsub.f32 %v608_v19, %v625_v49 }
 0x495   :  { %v652_v51 = vmul.f32 1.442695, %v641_v50 }
 0x496   :  { %v622_v52 = vpop.xlane.xlu0 %621 }
 0x497   :  { %1788 = vpow2.f32 %v652_v51  ;;  %v640_v53 = vsub.f32 %v607_v22, %v622_v52 }
 0x499   :  { %v650_v54 = vmul.f32 1.442695, %v640_v53 }
 0x49a   :  { %v631_v56 = vpop.xlane.xlu1 %630 }
 0x49b   :  { %1790 = vpow2.f32 %v650_v54  ;;  %v628_v57 = vpop.xlane.xlu0 %627  ;;  %v643_v58 = vsub.f32 %v610_v25, %v631_v56 }
 0x49c   :  { %v642_v59 = vsub.f32 %v609_v27, %v628_v57 }
 0x49d   :  { %v656_v3 = vmul.f32 1.442695, %v643_v58  ;;  %v54_v58 = vld [vmem:[#allocation5 + $0x28] sm:$0xff] }
 0x49e   :  { %v637_v60 = vpop.xlane.xlu1 %636  ;;  %v654_v5 = vmul.f32 1.442695, %v642_v59  ;;  %v55_v59 = vld [vmem:[#allocation5 + $0x30] sm:$0xff] }
 0x49f   :  { %v645_v61 = vsub.f32 %v612_v31, %v637_v60  ;;  %v634_v62 = vpop.xlane.xlu0 %633  ;;  %v1680_v60 = vpack.c.bf16 %v55_v59, %v54_v58 }
 0x4a0   :  { %v644_v63 = vsub.f32 %v611_v33, %v634_v62  ;;  %v57_v62 = vld [vmem:[#allocation5 + $0x40] sm:$0xff] }
 0x4a1   :  { %v2046_v2 = vpop.eup %1788  ;;  %v660_v4 = vmul.f32 1.442695, %v645_v61  ;;  %v56_v61 = vld [vmem:[#allocation5 + $0x38] sm:$0xff] }
 0x4a2   :  { %v658_v6 = vmul.f32 1.442695, %v644_v63  ;;  %v671_v7 = vsel %vm613_vm11, %v2046_v2, 0.0  ;;  %v1684_v63 = vpack.c.bf16 %v57_v62, %v56_v61  ;;  %v1434_v61 = vld [vmem:[#allocation5 + $0x4] ss:$0 sm:$0xff] }
 0x4a3   :  { %1792 = vpow2.f32 %v660_v4  ;;  %672 = vadd.xlane.f32.xlu1 %v671_v7 }
 0x4a4   :  { %1794 = vpow2.f32 %v658_v6 }
 0x4a5   :  { %v2050_v8 = vpop.eup %1790  ;;  %1796 = vpow2.f32 %v656_v3 }
 0x4a6   :  { %1798 = vpow2.f32 %v654_v5  ;;  %v668_v9 = vsel %vm613_vm11, %v2050_v8, 0.0 }
 0x4a7   :  { %669 = vadd.xlane.f32.xlu0 %v668_v9 }
 0x4ad   :  { %v2054_v10 = vpop.eup %1792 }
 0x4ae   :  { %v2056_v11 = vpop.eup %1794  ;;  %v683_v12 = vsel %vm613_vm11, %v2054_v10, 0.0 }
 0x4af   :  { %v2060_v13 = vpop.eup %1796  ;;  %684 = vadd.xlane.f32.xlu1 %v683_v12  ;;  %v680_v14 = vsel %vm613_vm11, %v2056_v11, 0.0 }
 0x4b0   :  { %v1799_v15 = vpop.eup %1798  ;;  %681 = vadd.xlane.f32.xlu0 %v680_v14  ;;  %v677_v16 = vsel %vm613_vm11, %v2060_v13, 0.0 }
 0x4b1   :  { %v674_v17 = vsel %vm613_vm11, %v1799_v15, 0.0 }
 0x4b3   :  { %678 = vadd.xlane.f32.xlu1 %v677_v16 }
 0x4b4   :  { %675 = vadd.xlane.f32.xlu0 %v674_v17 }
 0x4c3   :  { %v667_v21 = vpop.xlane.xlu1 %666 }
 0x4c4   :  { %1766 = vrot.lane.b32.xlu1 %v1971_v44, %s1904_s9  ;;  %v664_v18 = vpop.xlane.xlu0 %663 }
 0x4c5   :  { %1800 = vrcp.f32 %v664_v18 }
 0x4c6   :  { %1802 = vrcp.f32 %v667_v21 }
 0x4c8   :  { %1771 = vrot.lane.b32.xlu1 %v1975_v48, %s1904_s9 }
 0x4ca   :  { %1761 = vrot.lane.b32.xlu0 %v1968_v41, %s1904_s9 }
 0x4cc   :  { %1776 = vrot.lane.b32.xlu1 %v1984_v55, %s1904_s9 }
 0x4cf   :  { %v1801_v19 = vpop.eup %1800 }
 0x4d0   :  { %v694_v20 = vmul.f32 %v1801_v19, %v1787_v45  ;;  %v1803_v32 = vpop.eup %1802 }
 0x4d1   :  { %v695_v40 = vmul.f32 %v1803_v32, %v2041_v43 }
 0x4d2   :  { %1551 = vmatprep.mubr.msk.f32.mxu1 %vm613_vm11, %v694_v20 }
 0x530   :  { %v673_v22 = vpop.xlane.xlu1 %672 }
 0x534   :  { %v670_v23 = vpop.xlane.xlu0 %669 }
 0x535   :  { %1804 = vrcp.f32 %v670_v23 }
 0x53c   :  { %v685_v24 = vpop.xlane.xlu1 %684 }
 0x53d   :  { %v682_v25 = vpop.xlane.xlu0 %681 }
 0x53f   :  { %v1805_v35 = vpop.eup %1804 }
 0x540   :  { %v679_v44 = vpop.xlane.xlu1 %678  ;;  %v696_v49 = vmul.f32 %v1805_v35, %v2050_v8  ;;  %v58_v35 = vld [vmem:[#allocation5 + $0x48] sm:$0xff] }
 0x541   :  { %1806 = vrcp.f32 %v679_v44  ;;  %v676_v26 = vpop.xlane.xlu0 %675 }
 0x542   :  { %1808 = vrcp.f32 %v676_v26 }
 0x543   :  { %1810 = vrcp.f32 %v673_v22  ;;  %v1431_v22 = vld [vmem:[#allocation5 + $0x3] ss:$0 sm:$0xff] }
 0x544   :  { %1812 = vrcp.f32 %v682_v25  ;;  %v1767_v41 = vpop.permute.xlu1 %1766 }
 0x545   :  { %v1762_v48 = vpop.permute.xlu0 %1761  ;;  %v1769_v55 = vunpack.i.h.bf16 %v1767_v41  ;;  %v1768_v27 = vunpack.i.l.bf16 %v1767_v41  ;;  %1814 = vrcp.f32 %v685_v24 }
 0x546   :  { %v1764_v28 = vunpack.i.h.bf16 %v1762_v48  ;;  %v1763_v29 = vunpack.i.l.bf16 %v1762_v48 }
 0x547   :  { %v1668_v36 = vpack.c.bf16 %v1769_v55, %v1768_v27 }
 0x548   :  { %v1664_v30 = vpack.c.bf16 %v1764_v28, %v1763_v29  ;;  %v1772_v31 = vpop.permute.xlu1 %1771 }
 0x549   :  { %v1774_v33 = vunpack.i.h.bf16 %v1772_v31  ;;  %v1773_v34 = vunpack.i.l.bf16 %v1772_v31 }
 0x54a   :  { %1665 = vmatprep.subr.bf16.mxu1 %v1664_v30 }
 0x54b   :  { %v1807_v37 = vpop.eup %1806  ;;  %v1672_v38 = vpack.c.bf16 %v1774_v33, %v1773_v34  ;;  %1667 = vmatpush3.bf16.msra.mxu1 %v1664_v30 }
 0x54c   :  { %v1809_v39 = vpop.eup %1808  ;;  %v1777_v42 = vpop.permute.xlu1 %1776  ;;  %1669 = vmatprep.subr.bf16.mxu1 %v1668_v36  ;;  %v699_v52 = vmul.f32 %v1807_v37, %v2060_v13 }
 0x54d   :  { %v1811_v45 = vpop.eup %1810  ;;  %v1779_v46 = vunpack.i.h.bf16 %v1777_v42  ;;  %v1778_v47 = vunpack.i.l.bf16 %v1777_v42  ;;  %1673 = vmatprep.subr.bf16.mxu0 %v1672_v38  ;;  %v698_v50 = vmul.f32 %v1809_v39, %v1799_v15  ;;  %v61_v39 = vld [vmem:[#allocation5 + $0x60] sm:$0xff]  ;;  %v62_v42 = vld [vmem:[#allocation5 + $0x68] sm:$0xff] }
 0x54e   :  { %v1813_v51 = vpop.eup %1812  ;;  %1552 = vmatmul.mubr.msk.f32.vlgmr.msra.gmra.mrb[8].mxu1 %vm613_vm11, %v695_v40  ;;  %1675 = vmatpush3.bf16.msra.mxu0 %v1672_v38  ;;  %v697_v43 = vmul.f32 %v1811_v45, %v2046_v2  ;;  %v60_v38 = vld [vmem:[#allocation5 + $0x58] sm:$0xff]  ;;  %v63_v45 = vld [vmem:[#allocation5 + $0x70] sm:$0xff] }
 0x54f   :  { %v1676_v53 = vpack.c.bf16 %v1779_v46, %v1778_v47  ;;  %1671 = vmatpush3.bf16.msra.mxu1 %v1668_v36  ;;  %1558 = vmatprep.mubr.msk.f32.mxu1 %vm613_vm11, %v696_v49  ;;  %v1815_v54 = vpop.eup %1814  ;;  %v700_v56 = vmul.f32 %v1813_v51, %v2056_v11  ;;  %v59_v36 = vld [vmem:[#allocation5 + $0x50] sm:$0xff]  ;;  %v1692_v40 = vpack.c.bf16 %v61_v39, %v60_v38  ;;  %v64_v46 = vld [vmem:[#allocation5 + $0x78] sm:$0xff]  ;;  %v65_v49 = vld [vmem:[#allocation5 + $0x80] sm:$0xff] }
 0x550   :  { %1565 = vmatprep.mubr.msk.f32.mxu0 %vm613_vm11, %v698_v50  ;;  %v701_v57 = vmul.f32 %v1815_v54, %v2054_v10  ;;  %1681 = vmatprep.subr.bf16.mxu0 %v1680_v60  ;;  %v1688_v37 = vpack.c.bf16 %v59_v36, %v58_v35  ;;  %v1696_v47 = vpack.c.bf16 %v63_v45, %v62_v42  ;;  %v66_v51 = vld [vmem:[#allocation5 + $0x88] sm:$0xff] }
 0x551   :  { %1566 = vmatmul.mubr.msk.f32.vlgmr.msra.gmra.mrb[2].mxu0 %vm613_vm11, %v699_v52  ;;  %1677 = vmatprep.subr.bf16.mxu1 %v1676_v53  ;;  %v1700_v50 = vpack.c.bf16 %v65_v49, %v64_v46  ;;  %v67_v52 = vld [vmem:[#allocation5 + $0x90] sm:$0xff] }
 0x552   :  { %1559 = vmatmul.mubr.msk.f32.vlgmr.msra.gmra.mrb[10].mxu1 %vm613_vm11, %v697_v43  ;;  %1683 = vmatpush3.bf16.msra.mxu0 %v1680_v60 }
 0x553   :  { %1679 = vmatpush3.bf16.msra.mxu1 %v1676_v53  ;;  %1572 = vmatprep.mubr.msk.f32.mxu1 %vm613_vm11, %v700_v56  ;;  %v1704_v53 = vpack.c.bf16 %v67_v52, %v66_v51 }
 0x554   :  { %1685 = vmatprep.subr.bf16.mxu0 %v1684_v63  ;;  %1689 = vmatprep.subr.bf16.mxu1 %v1688_v37 }
 0x556   :  { %1573 = vmatmul.mubr.msk.f32.vlgmr.msra.gmra.mrb[12].mxu1 %vm613_vm11, %v701_v57  ;;  %1687 = vmatpush3.bf16.msra.mxu0 %v1684_v63  ;;  %v1435_v63 = vld [vmem:[#allocation5 + $0x5] ss:$0 sm:$0xff] }
 0x557   :  { %1691 = vmatpush3.bf16.msra.mxu1 %v1688_v37  ;;  %1697 = vmatprep.subr.bf16.mxu0 %v1696_v47 }
 0x558   :  { %1693 = vmatprep.subr.bf16.mxu1 %v1692_v40 }
 0x55b   :  { %1695 = vmatpush3.bf16.msra.mxu1 %v1692_v40 }
 0x621   :  { %v1553_v2 = vpop.f32.mrb[8].mxu1 }
 0x622   :  { %v780_v3 = vpop.f32.mrb[9].mxu1 }
 0x624   :  { %v1567_v4 = vpop.f32.mrb[2].mxu0 }
 0x625   :  { %v1560_v5 = vpop.f32.mrb[10].mxu1  ;;  %v954_v6 = vpop.f32.mrb[3].mxu0 }
 0x626   :  { %1054 = vrot.lane.b32.xlu1 %v1560_v5, %s1898_s20  ;;  %v867_v7 = vpop.f32.mrb[11].mxu1 }
 0x627   :  { %1052 = vrot.lane.b32.xlu0 %v867_v7, %s1898_s20 }
 0x629   :  { %v1574_v8 = vpop.f32.mrb[12].mxu1 }
 0x62a   :  { %1062 = vrot.lane.b32.xlu1 %v1567_v4, %s1905_s10  ;;  %v1041_v9 = vpop.f32.mrb[13].mxu1 }
 0x62b   :  { %1060 = vrot.lane.b32.xlu0 %v954_v6, %s1905_s10 }
 0x62e   :  { %1070 = vrot.lane.b32.xlu1 %v1574_v8, %s1906_s11  ;;  %v68_v8 = vld [vmem:[#allocation5 + $0x98] sm:$0xff] }
 0x62f   :  { %1068 = vrot.lane.b32.xlu0 %v1041_v9, %s1906_s11  ;;  %v69_v9 = vld [vmem:[#allocation5 + $0xa0] sm:$0xff] }
 0x698   :  { %v1055_v10 = vpop.permute.xlu1 %1054 }
 0x699   :  { %v1053_v11 = vpop.permute.xlu0 %1052  ;;  %v1075_v16 = vsel %vm221_vm1, %v1553_v2, %v1055_v10  ;;  %v1708_v10 = vpack.c.bf16 %v69_v9, %v68_v8 }
 0x69a   :  { %v1074_v14 = vsel %vm221_vm1, %v780_v3, %v1053_v11  ;;  %v70_v11 = vld [vmem:[#allocation5 + $0xa8] sm:$0xff] }
 0x69c   :  { %v1063_v12 = vpop.permute.xlu1 %1062 }
 0x69d   :  { %v1061_v13 = vpop.permute.xlu0 %1060  ;;  %v1077_v19 = vsel %vm613_vm11, %v1075_v16, %v1063_v12  ;;  %v71_v12 = vld [vmem:[#allocation5 + $0xb0] sm:$0xff] }
 0x69e   :  { %v1076_v17 = vsel %vm613_vm11, %v1074_v14, %v1061_v13  ;;  %v1712_v13 = vpack.c.bf16 %v71_v12, %v70_v11  ;;  %v72_v14 = vld [vmem:[#allocation5 + $0xb8] sm:$0xff] }
 0x6a0   :  { %v1071_v15 = vpop.permute.xlu1 %1070 }
 0x6a1   :  { %v1069_v18 = vpop.permute.xlu0 %1068  ;;  %v1080_v21 = vsel %vm1078_vm12, %v1077_v19, %v1071_v15  ;;  %v73_v15 = vld [vmem:[#allocation5 + $0xc0] sm:$0xff] }
 0x6a2   :  { %v1079_v20 = vsel %vm1078_vm12, %v1076_v17, %v1069_v18  ;;  %v1716_v16 = vpack.c.bf16 %v73_v15, %v72_v14  ;;  %v74_v17 = vld [vmem:[#allocation5 + $0xc8] sm:$0xff]  ;;  %v75_v18 = vld [vmem:[#allocation5 + $0xd0] sm:$0xff] }
 0x6a3   :  { %1583 = vmatprep.mubr.msk.f32.mxu0 %vm78_vm0, %v1079_v20  ;;  %v1720_v19 = vpack.c.bf16 %v75_v18, %v74_v17  ;;  %v76_v20 = vld [vmem:[#allocation5 + $0xd8] sm:$0xff] }
 0x6a4   :  { %1584 = vmatmul.mubr.msk.f32.vlgmr.msra.gmra.mrb[4].mxu0 %vm78_vm0, %v1080_v21  ;;  %v77_v21 = vld [vmem:[#allocation5 + $0xe0] sm:$0xff] }
 0x6a5   :  { %1699 = vmatpush3.bf16.msra.mxu0 %v1696_v47 }
 0x6a6   :  { %1701 = vmatprep.subr.bf16.mxu0 %v1700_v50 }
 0x6a9   :  { %1703 = vmatpush3.bf16.msra.mxu0 %v1700_v50 }
 0x6aa   :  { %1705 = vmatprep.subr.bf16.mxu0 %v1704_v53 }
 0x6ad   :  { %1707 = vmatpush3.bf16.msra.mxu0 %v1704_v53 }
 0x6ae   :  { %1709 = vmatprep.subr.bf16.mxu0 %v1708_v10 }
 0x6b1   :  { %1711 = vmatpush3.bf16.msra.mxu0 %v1708_v10 }
 0x6b2   :  { %1713 = vmatprep.subr.bf16.mxu0 %v1712_v13 }
 0x6b5   :  { %1715 = vmatpush3.bf16.msra.mxu0 %v1712_v13 }
 0x6b6   :  { %1717 = vmatprep.subr.bf16.mxu0 %v1716_v16 }
 0x6b9   :  { %1719 = vmatpush3.bf16.msra.mxu0 %v1716_v16 }
 0x6ba   :  { %1721 = vmatprep.subr.bf16.mxu0 %v1720_v19 }
 0x6bd   :  { %1723 = vmatpush3.bf16.msra.mxu0 %v1720_v19 }
 0x777   :  { %v1585_v23 = vpop.f32.mrb[4].mxu0 }
 0x778   :  { %v1163_v24 = vadd.f32 %v1585_v23, %v1431_v22  ;;  %v1157_v25 = vpop.f32.mrb[5].mxu0  ;;  %v1436_v23 = vld [vmem:[#allocation5 + $0x6] ss:$0 sm:$0xff] }
 0x779   :  { %v1158_v44 = vadd.f32 %v1431_v22, %v1157_v25  ;;  %v1724_v22 = vpack.c.bf16 %v77_v21, %v76_v20 }
 0x77a   :  { %v2094_v26 = vadd.f32 %v1163_v24, %v1955_v1 }
 0x77b   :  { %v2097_v41 = vadd.f32 %v1158_v44, %v1953_v0  ;;  %1725 = vmatprep.subr.bf16.mxu0 %v1724_v22 }
 0x77c   :  { %v1171_v48 = vsel %vm78_vm0, %v2094_v26, 0.0  ;;  %1727 = vmatpush3.bf16.msra.mxu0 %v1724_v22 }
 0x77d   :  { %1172 = vadd.xlane.f32.xlu1 %v1171_v48  ;;  %v1168_v55 = vsel %vm78_vm0, %v2097_v41, 0.0 }
 0x77e   :  { %1169 = vadd.xlane.f32.xlu0 %v1168_v55 }
 0x80a   :  { %v1173_v27 = vpop.xlane.xlu1 %1172 }
 0x80b   :  { %v1175_v28 = vmul.f32 0.03125, %v1173_v27  ;;  %v1170_v29 = vpop.xlane.xlu0 %1169 }
 0x80c   :  { %v1174_v30 = vmul.f32 0.03125, %v1170_v29 }
 0x80d   :  { %v1177_v31 = vsub.f32 %v2094_v26, %v1175_v28 }
 0x80e   :  { %v1176_v1 = vsub.f32 %v2097_v41, %v1174_v30 }
 0x80f   :  { %v1179_v33 = vmul.f32 %v1177_v31, %v1177_v31 }
 0x810   :  { %v1178_v32 = vmul.f32 %v1176_v1, %v1176_v1 }
 0x811   :  { %v1183_v34 = vsel %vm78_vm0, %v1179_v33, 0.0 }
 0x812   :  { %v1180_v0 = vsel %vm78_vm0, %v1178_v32, 0.0 }
 0x813   :  { %1181 = vadd.xlane.f32.xlu0 %v1180_v0 }
 0x817   :  { %1184 = vadd.xlane.f32.xlu0 %v1183_v34  ;;  %v1439_v34 = vld [vmem:[#allocation5 + $0x7] ss:$0 sm:$0xff] }
 0x8a0   :  { %v1182_v43 = vpop.xlane.xlu0 %1181 }
 0x8a1   :  { %v1186_v54 = vmul.f32 0.03125, %v1182_v43 }
 0x8a3   :  { %v1188_v56 = vadd.f32 1e-05, %v1186_v54 }
 0x8a4   :  { %v1185_v57 = vpop.xlane.xlu0 %1184 }
 0x8a5   :  { %1816 = vrsqrt.f32 %v1188_v56  ;;  %v1187_v58 = vmul.f32 0.03125, %v1185_v57 }
 0x8a7   :  { %v1189_v59 = vadd.f32 1e-05, %v1187_v58 }
 0x8a9   :  { %1818 = vrsqrt.f32 %v1189_v59 }
 0x8af   :  { %v1817_v60 = vpop.eup %1816 }
 0x8b0   :  { %v1192_v62 = vmul.f32 %v1817_v60, %v1176_v1 }
 0x8b2   :  { %v1198_v2 = vmul.f32 %v1434_v61, %v1192_v62 }
 0x8b3   :  { %v1819_v3 = vpop.eup %1818 }
 0x8b4   :  { %v1193_v4 = vmul.f32 %v1819_v3, %v1177_v31  ;;  %v1204_v5 = vadd.f32 %v1435_v63, %v1198_v2 }
 0x8b6   :  { %v1199_v6 = vmul.f32 %v1434_v61, %v1193_v4  ;;  %1594 = vmatprep.mubr.msk.f32.mxu1 %vm78_vm0, %v1204_v5 }
 0x8b8   :  { %v1205_v7 = vadd.f32 %v1435_v63, %v1199_v6 }
 0x8ba   :  { %1595 = vmatmul.mubr.msk.f32.vlgmr.msra.gmra.mrb[14].mxu1 %vm78_vm0, %v1205_v7 }
 0x98d   :  { %v1596_v24 = vpop.f32.mrb[14].mxu1 }
 0x98e   :  { %v1288_v25 = vadd.f32 %v1596_v24, %v1436_v23  ;;  %v1282_v44 = vpop.f32.mrb[15].mxu1 }
 0x98f   :  { %v1283_v48 = vadd.f32 %v1436_v23, %v1282_v44 }
 0x990   :  { %v1294_v55 = vmul.f32 0.70710677, %v1288_v25  ;;  %v1292_v32 = vmul.f32 0.5, %v1288_v25 }
 0x991   :  { %v1293_v27 = vmul.f32 0.70710677, %v1283_v48  ;;  %v1291_v31 = vmul.f32 0.5, %v1283_v48 }
 0x992   :  { %1820 = verf.f32 %v1294_v55 }
 0x993   :  { %1822 = verf.f32 %v1293_v27 }
 0x99c   :  { %v1821_v28 = vpop.eup %1820 }
 0x99d   :  { %v1823_v29 = vpop.eup %1822  ;;  %v1298_v30 = vadd.f32 1.0, %v1821_v28 }
 0x99e   :  { %v1297_v1 = vadd.f32 1.0, %v1823_v29 }
 0x99f   :  { %v1300_v33 = vmul.f32 %v1298_v30, %v1292_v32 }
 0x9a0   :  { %v1299_v0 = vmul.f32 %v1297_v1, %v1291_v31 }
 0x9a2   :  { %1629 = vmatprep.mubr.f32.mxu0 %v1299_v0 }
 0x9a3   :  { %1630 = vmatmul.mubr.f32.vlgmr.msra.gmra.mrb[6].mxu0 %v1300_v33 }
 0xa76   :  { %v1631_v35 = vpop.f32.mrb[6].mxu0 }
 0xa77   :  { %v1377_v36 = vadd.f32 %v1631_v35, %v1439_v34  ;;  %v1371_v37 = vpop.f32.mrb[7].mxu0 }
 0xa78   :  { %v1372_v38 = vadd.f32 %v1439_v34, %v1371_v37 }
 0xa79   :  { %v1381_v39 = vadd.f32 %v1377_v36, %v2094_v26 }
 0xa7a   :  { %v1380_v40 = vadd.f32 %v1372_v38, %v2097_v41 }
 0xa7b   :  { %1383 = vst.msk [vmem:[#allocation7 + $0x8] sm:$0xff] %vm78_vm0, %v1381_v39 }
 0xa7c   :  { %1382 = vst.msk [vmem:[#allocation7] sm:$0xff] %vm78_vm0, %v1380_v40 }
 0xa7d   :  { %1879 = shalt.err (!%p1876_p6)
}
 0xa7e   :  { %s1880_s17 = scalar_lea.hbm %s2130_s2, 256 }
 0xa7f   :  { %p1881_p7 = scmp.ne.s32.totalorder %s2130_s2, %s1880_s17  ;;  %p1884_p8 = scmp.lt.u32.totalorder %s1880_s17, %s2130_s2 }
 0xa81   :  { %p1886_p9 = pnand %p1884_p8, %p1881_p7 }
 0xa83   :  { %1889 = shalt.err (!%p1886_p9)
}
 0xa84   :  { %1395 = dma.vmem_to_hbm [thread:$0]  %s1390_s13, 256, %s2130_s2, [#allocation4], %s1897_s19, %s1897_s19, %s1898_s20  }
 0xa85   :  { %1894 = dma.done.wait [#allocation4], 256  }
 0xa86   :  { %1895 = vsyncadd [#allocation4], 4294967040 }
 0xa87   :  { %1399 = vsyncpa [#allocation3], 1 }
 0xa88   :  { %1400 = vsyncpa [#allocation6], 1 }
 0xa89   :  { %1401 = vsyncpa [#allocation4], 1 }

</bundles_post_ra>
